<compile_context>
chip_gen: v5e
topology: v5e:2x2
jax: 0.10.0
libtpu: 0.0.40
codegen_flags: <defaults>
</compile_context>

<pallas_src>
import jax
import jax.numpy as jnp
import numpy as np
from jax.experimental import pallas as pl
from jax.experimental.pallas import tpu as pltpu  # noqa: F401  (TPU backend)

_LANES = 128


def _copy_kernel(x_ref, o_ref):
    # Straight VMEM copy of the whole lane-dense tile (single block, one TC).
    o_ref[...] = x_ref[...]


def _identity_forward(x: jax.Array) -> jax.Array:
    """Module forward: return x unchanged, via a lane-dense Pallas copy."""
    orig_shape = x.shape
    orig_dtype = x.dtype
    n = x.size

    # Flatten and (only if needed) pad to a multiple of 128 so the last dim is
    # fully lane-dense. For the module's (1,16,16,3) input 768 % 128 == 0, so
    # no padding happens and the reshape is a pure bitcast under jit.
    pad = (-n) % _LANES
    flat = x.reshape(-1)
    if pad:
        flat = jnp.pad(flat, (0, pad))
    rows = (n + pad) // _LANES
    x2d = flat.reshape(rows, _LANES)

    out2d = pl.pallas_call(
        _copy_kernel,
        out_shape=jax.ShapeDtypeStruct((rows, _LANES), orig_dtype),
        # Gridless, full-block call: default specs bring the whole array into
        # VMEM as one block (full-array blocks are exempt from (8,128) tiling).
        # Output aliases the input buffer; combined with the jit-level
        # donation below this avoids any fresh HBM allocation.
        input_output_aliases={0: 0},
    )(x2d)

    out = out2d.reshape(-1)
    if pad:
        out = out[:n]
    return out.reshape(orig_shape)


# jit so reshapes are free bitcasts and only one executable launches;
# donate the input so the in/out aliasing actually holds (no defensive copy).
identity_forward = jax.jit(_identity_forward, donate_argnums=0)


if __name__ == "__main__":
    key = jax.random.PRNGKey(0)
    # Matches the module's implied input: x3 = torch.randn(1, 16, 16, 3)
    x3 = jax.random.normal(key, (1, 16, 16, 3), dtype=jnp.float32)

    # Snapshot to host BEFORE the call: x3's device buffer is donated.
    x3_host = np.asarray(x3)

    out = identity_forward(x3)
    jax.block_until_ready(out)

    assert out.shape == x3_host.shape
    assert out.dtype == jnp.float32
    assert np.array_equal(np.asarray(out), x3_host)
    print("KERNEL_OK")
</pallas_src>

<mosaic_0001>
module attributes {stable_mosaic.version = 11 : i64} {
  func.func @_copy_kernel(%arg0: memref<6x128xf32, #tpu.memory_space<vmem>>, %arg1: memref<6x128xf32, #tpu.memory_space<vmem>>) attributes {dimension_semantics = [], scalar_prefetch = 0 : i64, scratch_operands = 0 : i64, tpu.core_type = #tpu.core_type<tc>} {
    %c0 = arith.constant 0 : index
    %c0_0 = arith.constant 0 : index
    %0 = vector.load %arg0[%c0, %c0_0] : memref<6x128xf32, #tpu.memory_space<vmem>>, vector<6x128xf32>
    %c0_1 = arith.constant 0 : index
    %c0_2 = arith.constant 0 : index
    %1 = vector.load %arg1[%c0_1, %c0_2] : memref<6x128xf32, #tpu.memory_space<vmem>>, vector<6x128xf32>
    tpu.vector_store %arg1[%c0_1, %c0_2], %0 {strides = array<i32>} : memref<6x128xf32, #tpu.memory_space<vmem>>, vector<6x128xf32>,
    return
  }
}

</mosaic_0001>

<bundles_post_ra>
// kernel: _identity_forward.1
= control target key start
LH: loop header
LB: loop body
LE: loop exit
PB: predicated region body
PF: predicated region fallthrough
CT: control target
= control target key end

     0   :  { %s30_s0 = inlined_call_operand.vmem [shape: f32[6,128], index: 0, kind: input, shape index: {}, may-alias: {0,1}]   ;;  %s31_s1 = inlined_call_operand.vmem [shape: f32[6,128], index: 1, kind: output, shape index: {}, may-alias: {0,1}]  }
   0x1   :  { %v8_v0 = vld [vmem:[%s30_s0] sm:$0x3f] }
   0x2   :  { %9 = vst [vmem:[%s31_s1] sm:$0x3f] %v8_v0 }

</bundles_post_ra>
